<compile_context>
chip_gen: v6e
topology: v6e:2x2x1
jax: 0.10.0
libtpu: 0.0.40
codegen_flags: <defaults>
</compile_context>

<pallas_src>
import jax
import jax.numpy as jnp
from jax.experimental import pallas as pl
from jax.experimental.pallas import tpu as pltpu

K_IN = 1000     # input features
H1 = 128
H2 = 64
NEG_SLOPE = 0.2


def _mlp_kernel(x_ref, w1_ref, b1_ref, w2_ref, b2_ref, w3_ref, b3_ref, o_ref):
    # x arrives f32 straight from HBM (no wrapper-side pad/cast). Cast to bf16 here
    # so the MXU runs at bf16 rate while HBM traffic stays at a single f32 read of x.
    x_bf = x_ref[...].astype(jnp.bfloat16)                      # (TB, 1000)

    # Layer 1: ragged K=1000 contraction on the MXU, f32 accumulation.
    h = jnp.dot(x_bf, w1_ref[...], preferred_element_type=jnp.float32)
    h = h + b1_ref[...]
    h = jnp.where(h > 0, h, NEG_SLOPE * h)                      # LeakyReLU(0.2)

    # Layer 2: (TB,128)bf16 @ (128,64)bf16 -> f32 on the MXU.
    h = jnp.dot(h.astype(jnp.bfloat16), w2_ref[...],
                preferred_element_type=jnp.float32)
    h = h + b2_ref[...]
    h = jnp.where(h > 0, h, NEG_SLOPE * h)                      # LeakyReLU(0.2)

    # Layer 3 (K=64, N=1): VPU multiply + cross-lane reduce instead of a
    # single-output-column MXU matmul.
    out = jnp.sum(h * w3_ref[...], axis=-1, keepdims=True)      # (TB, 1) f32
    o_ref[...] = (out + b3_ref[...]).astype(o_ref.dtype)


def _round_up(x, m):
    return (x + m - 1) // m * m


def _pick_tile(batch):
    if batch <= 512:
        # Single grid step covering the whole batch; block == full array dims is
        # always layout-legal and avoids any batch padding / wasted rows.
        return batch
    # Large batch: target >= 4 grid steps (keeps both v7x TensorCores busy) but cap
    # at 2048 rows/step so the f32 x tile (double-buffered) stays ~16 MiB of VMEM.
    return min(2048, _round_up(-(-batch // 4), 128))


def discriminator_forward(x, params):
    """x: (B, 1000) float32 -> (B, 1) float32."""
    w1, b1, w2, b2, w3, b3 = params
    B = x.shape[0]
    TB = _pick_tile(B)
    grid = (pl.cdiv(B, TB),)

    # Weight-only prep (tiny, one-time). x is passed to the kernel untouched.
    w1_bf = w1.astype(jnp.bfloat16)        # (1000, 128)
    w2_bf = w2.astype(jnp.bfloat16)        # (128, 64)
    w3_row = w3.reshape(1, H2)             # (1, 64) f32 row for the VPU path

    const = lambda shape: pl.BlockSpec(shape, lambda i: (0, 0))

    out = pl.pallas_call(
        _mlp_kernel,
        out_shape=jax.ShapeDtypeStruct((B, 1), jnp.float32),
        grid=grid,
        in_specs=[
            pl.BlockSpec((TB, K_IN), lambda i: (i, 0)),   # x tile: pipelined per step
            const((K_IN, H1)),                            # w1: VMEM-resident
            const((1, H1)),                               # b1
            const((H1, H2)),                              # w2
            const((1, H2)),                               # b2
            const((1, H2)),                               # w3 row
            const((1, 1)),                                # b3
        ],
        out_specs=pl.BlockSpec((TB, 1), lambda i: (i, 0)),
        compiler_params=pltpu.CompilerParams(
            dimension_semantics=("parallel",),            # megacore on v7x
            vmem_limit_bytes=48 * 1024 * 1024,            # f32 x tiles > v5e 16 MiB default
        ),
    )(x, w1_bf, b1, w2_bf, b2, w3_row, b3)
    return out


def init_params(key):
    """PyTorch-style uniform(+-1/sqrt(fan_in)) init; weights stored (in, out)."""
    def linear(key, fan_in, fan_out):
        kw, kb = jax.random.split(key)
        bound = 1.0 / jnp.sqrt(fan_in)
        w = jax.random.uniform(kw, (fan_in, fan_out), jnp.float32, -bound, bound)
        b = jax.random.uniform(kb, (1, fan_out), jnp.float32, -bound, bound)
        return w, b

    k1, k2, k3 = jax.random.split(key, 3)
    w1, b1 = linear(k1, K_IN, H1)
    w2, b2 = linear(k2, H1, H2)
    w3, b3 = linear(k3, H2, 1)
    return (w1, b1, w2, b2, w3, b3)


if __name__ == "__main__":
    key = jax.random.PRNGKey(0)
    kparam, kx = jax.random.split(key)

    params = init_params(kparam)
    x = jax.random.normal(kx, (8, K_IN), jnp.float32)      # batch=8, in_features=1000

    out = jax.jit(discriminator_forward)(x, params)
    out = jax.block_until_ready(out)

    # Reference in plain JAX mirroring the kernel's bf16 quantization of x/w1/w2/h1
    # (f32 accumulation and f32 biases/activations otherwise).
    w1, b1, w2, b2, w3, b3 = params
    bf = lambda a: a.astype(jnp.bfloat16)
    h = jnp.dot(bf(x), bf(w1), preferred_element_type=jnp.float32) + b1
    h = jnp.where(h > 0, h, NEG_SLOPE * h)
    h = jnp.dot(bf(h), bf(w2), preferred_element_type=jnp.float32) + b2
    h = jnp.where(h > 0, h, NEG_SLOPE * h)
    ref = jnp.sum(h * w3.reshape(1, H2), axis=-1, keepdims=True) + b3

    assert out.shape == (8, 1)
    assert jnp.allclose(out, ref, atol=1e-2, rtol=1e-2)

    print("KERNEL_OK")
</pallas_src>

<mosaic_0001>
module attributes {stable_mosaic.version = 11 : i64} {
  func.func @_mlp_kernel(%arg0: i32, %arg1: memref<8x1000xf32, #tpu.memory_space<vmem>>, %arg2: memref<1000x128xbf16, #tpu.memory_space<vmem>>, %arg3: memref<1x128xf32, #tpu.memory_space<vmem>>, %arg4: memref<128x64xbf16, #tpu.memory_space<vmem>>, %arg5: memref<1x64xf32, #tpu.memory_space<vmem>>, %arg6: memref<1x64xf32, #tpu.memory_space<vmem>>, %arg7: memref<1x1xf32, #tpu.memory_space<vmem>>, %arg8: memref<8x1xf32, #tpu.memory_space<vmem>>) attributes {dimension_semantics = [#tpu.dimension_semantics<parallel>], iteration_bounds = array<i64: 1>, scalar_prefetch = 0 : i64, scratch_operands = 0 : i64, tpu.core_type = #tpu.core_type<tc>, window_params = [{transform_indices = @transform_0, window_bounds = array<i64: 8, 1000>}, {pipeline_mode = #tpu.pipeline_mode<synchronous>, transform_indices = @transform_1, window_bounds = array<i64: 1000, 128>}, {pipeline_mode = #tpu.pipeline_mode<synchronous>, transform_indices = @transform_2, window_bounds = array<i64: 1, 128>}, {pipeline_mode = #tpu.pipeline_mode<synchronous>, transform_indices = @transform_3, window_bounds = array<i64: 128, 64>}, {pipeline_mode = #tpu.pipeline_mode<synchronous>, transform_indices = @transform_4, window_bounds = array<i64: 1, 64>}, {pipeline_mode = #tpu.pipeline_mode<synchronous>, transform_indices = @transform_5, window_bounds = array<i64: 1, 64>}, {pipeline_mode = #tpu.pipeline_mode<synchronous>, transform_indices = @transform_6, window_bounds = array<i64: 1, 1>}, {transform_indices = @transform_7, window_bounds = array<i64: 8, 1>}]} {
    %c0 = arith.constant 0 : index
    %c0_0 = arith.constant 0 : index
    %0 = vector.load %arg1[%c0, %c0_0] : memref<8x1000xf32, #tpu.memory_space<vmem>>, vector<8x1000xf32>
    %1 = arith.truncf %0 : vector<8x1000xf32> to vector<8x1000xbf16>
    %c0_1 = arith.constant 0 : index
    %c0_2 = arith.constant 0 : index
    %2 = vector.load %arg2[%c0_1, %c0_2] : memref<1000x128xbf16, #tpu.memory_space<vmem>>, vector<1000x128xbf16>
    %cst = arith.constant dense<0.000000e+00> : vector<8x128xf32>
    %3 = tpu.matmul %1, %2, %cst {dimension_numbers = #tpu.dot_dimension_numbers<[1], [0], [0], [1], [0, 0, 1, 1], [], []>} : vector<8x1000xbf16>, vector<1000x128xbf16>, vector<8x128xf32> -> vector<8x128xf32>
    %c0_3 = arith.constant 0 : index
    %c0_4 = arith.constant 0 : index
    %4 = vector.load %arg3[%c0_3, %c0_4] : memref<1x128xf32, #tpu.memory_space<vmem>>, vector<1x128xf32>
    %5 = vector.broadcast %4 : vector<1x128xf32> to vector<8x128xf32>
    %6 = arith.addf %3, %5 : vector<8x128xf32>
    %cst_5 = arith.constant 0.000000e+00 : f32
    %7 = vector.broadcast %cst_5 : f32 to vector<8x128xf32>
    %8 = arith.cmpf ogt, %6, %7 : vector<8x128xf32>
    %cst_6 = arith.constant 2.000000e-01 : f32
    %9 = vector.broadcast %cst_6 : f32 to vector<8x128xf32>
    %10 = arith.mulf %9, %6 : vector<8x128xf32>
    %11 = arith.select %8, %6, %10 : vector<8x128xi1>, vector<8x128xf32>
    %12 = arith.truncf %11 : vector<8x128xf32> to vector<8x128xbf16>
    %c0_7 = arith.constant 0 : index
    %c0_8 = arith.constant 0 : index
    %13 = vector.load %arg4[%c0_7, %c0_8] : memref<128x64xbf16, #tpu.memory_space<vmem>>, vector<128x64xbf16>
    %cst_9 = arith.constant dense<0.000000e+00> : vector<8x64xf32>
    %14 = tpu.matmul %12, %13, %cst_9 {dimension_numbers = #tpu.dot_dimension_numbers<[1], [0], [0], [1], [0, 0, 1, 1], [], []>} : vector<8x128xbf16>, vector<128x64xbf16>, vector<8x64xf32> -> vector<8x64xf32>
    %c0_10 = arith.constant 0 : index
    %c0_11 = arith.constant 0 : index
    %15 = vector.load %arg5[%c0_10, %c0_11] : memref<1x64xf32, #tpu.memory_space<vmem>>, vector<1x64xf32>
    %16 = vector.broadcast %15 : vector<1x64xf32> to vector<8x64xf32>
    %17 = arith.addf %14, %16 : vector<8x64xf32>
    %cst_12 = arith.constant 0.000000e+00 : f32
    %18 = vector.broadcast %cst_12 : f32 to vector<8x64xf32>
    %19 = arith.cmpf ogt, %17, %18 : vector<8x64xf32>
    %cst_13 = arith.constant 2.000000e-01 : f32
    %20 = vector.broadcast %cst_13 : f32 to vector<8x64xf32>
    %21 = arith.mulf %20, %17 : vector<8x64xf32>
    %22 = arith.select %19, %17, %21 : vector<8x64xi1>, vector<8x64xf32>
    %c0_14 = arith.constant 0 : index
    %c0_15 = arith.constant 0 : index
    %23 = vector.load %arg6[%c0_14, %c0_15] : memref<1x64xf32, #tpu.memory_space<vmem>>, vector<1x64xf32>
    %24 = vector.broadcast %23 : vector<1x64xf32> to vector<8x64xf32>
    %25 = arith.mulf %22, %24 : vector<8x64xf32>
    %cst_16 = arith.constant dense<0.000000e+00> : vector<8xf32>
    %26 = vector.multi_reduction <add>, %25, %cst_16 [1] : vector<8x64xf32> to vector<8xf32>
    %27 = vector.shape_cast %26 : vector<8xf32> to vector<8x1xf32>
    %c0_17 = arith.constant 0 : index
    %c0_18 = arith.constant 0 : index
    %28 = vector.load %arg7[%c0_17, %c0_18] : memref<1x1xf32, #tpu.memory_space<vmem>>, vector<1x1xf32>
    %29 = vector.broadcast %28 : vector<1x1xf32> to vector<8x1xf32>
    %30 = arith.addf %27, %29 : vector<8x1xf32>
    %c0_19 = arith.constant 0 : index
    %c0_20 = arith.constant 0 : index
    %31 = vector.load %arg8[%c0_19, %c0_20] : memref<8x1xf32, #tpu.memory_space<vmem>>, vector<8x1xf32>
    tpu.vector_store %arg8[%c0_19, %c0_20], %30 {strides = array<i32>} : memref<8x1xf32, #tpu.memory_space<vmem>>, vector<8x1xf32>,
    return
  }
  func.func @transform_0(%arg0: i32) -> (i32, i32) {
    %c0_i32 = arith.constant 0 : i32
    %c0_i32_0 = arith.constant 0 : i32
    return %arg0, %c0_i32 : i32, i32
  }
  func.func @transform_1(%arg0: i32) -> (i32, i32) {
    %c0_i32 = arith.constant 0 : i32
    %c0_i32_0 = arith.constant 0 : i32
    %c0_i32_1 = arith.constant 0 : i32
    return %c0_i32, %c0_i32_0 : i32, i32
  }
  func.func @transform_2(%arg0: i32) -> (i32, i32) {
    %c0_i32 = arith.constant 0 : i32
    %c0_i32_0 = arith.constant 0 : i32
    %c0_i32_1 = arith.constant 0 : i32
    return %c0_i32, %c0_i32_0 : i32, i32
  }
  func.func @transform_3(%arg0: i32) -> (i32, i32) {
    %c0_i32 = arith.constant 0 : i32
    %c0_i32_0 = arith.constant 0 : i32
    %c0_i32_1 = arith.constant 0 : i32
    return %c0_i32, %c0_i32_0 : i32, i32
  }
  func.func @transform_4(%arg0: i32) -> (i32, i32) {
    %c0_i32 = arith.constant 0 : i32
    %c0_i32_0 = arith.constant 0 : i32
    %c0_i32_1 = arith.constant 0 : i32
    return %c0_i32, %c0_i32_0 : i32, i32
  }
  func.func @transform_5(%arg0: i32) -> (i32, i32) {
    %c0_i32 = arith.constant 0 : i32
    %c0_i32_0 = arith.constant 0 : i32
    %c0_i32_1 = arith.constant 0 : i32
    return %c0_i32, %c0_i32_0 : i32, i32
  }
  func.func @transform_6(%arg0: i32) -> (i32, i32) {
    %c0_i32 = arith.constant 0 : i32
    %c0_i32_0 = arith.constant 0 : i32
    %c0_i32_1 = arith.constant 0 : i32
    return %c0_i32, %c0_i32_0 : i32, i32
  }
  func.func @transform_7(%arg0: i32) -> (i32, i32) {
    %c0_i32 = arith.constant 0 : i32
    %c0_i32_0 = arith.constant 0 : i32
    return %arg0, %c0_i32 : i32, i32
  }
}

</mosaic_0001>

<bundles_post_ra>
// kernel: discriminator_forward.1
= control target key start
LH: loop header
LB: loop body
LE: loop exit
PB: predicated region body
PF: predicated region fallthrough
CT: control target
= control target key end

     0   :  { %v1109_v41 = vmov 0   ;;  %vm556_vm0 = vcmask 1043456   ;;  %vm552_vm1 = vcmask 850944   ;;  %vm1111_vm2 = vmmov 0   ;;  %s1419_s1 = inlined_call_operand.vmem [shape: bf16[1000,128], index: 1, kind: input, shape index: {}]   ;;  %s1420_s0 = inlined_call_operand.vmem [shape: f32[8,1000], index: 0, kind: input, shape index: {}]   ;;  %s1421_s3 = inlined_call_operand.vmem [shape: bf16[128,64], index: 3, kind: input, shape index: {}]   ;;  %s1422_s2 = inlined_call_operand.vmem [shape: f32[1,128], index: 2, kind: input, shape index: {}]   ;;  %s1423_s6 = inlined_call_operand.<no memory space> [shape: f32[1,1], index: 6, kind: input, shape index: {}]   ;;  %s1424_s4 = inlined_call_operand.vmem [shape: f32[1,64], index: 4, kind: input, shape index: {}]   ;;  %s1425_s5 = inlined_call_operand.vmem [shape: f32[1,64], index: 5, kind: input, shape index: {}]   ;;  %s1426_s7 = inlined_call_operand.vmem [shape: f32[8,1], index: 7, kind: output, shape index: {}]  }
   0x1   :  { %v1038_v0 = vld [vmem:[%s1419_s1 + $0x78] sm:$0xff]   ;;  %v1042_v4 = vld [vmem:[%s1419_s1 + $0x70] sm:$0xff]   ;;  %v1046_v8 = vld [vmem:[%s1419_s1 + $0x68] sm:$0xff]   ;;  %vm846_vm5 = vcmask 523264   ;;  %vm858_vm6 = vcmask 7168  }
   0x2   :  { %v1039_v1 = vld [vmem:[%s1419_s1 + $0xf8] sm:$0xff]   ;;  %940 = vmatprep.subr.bf16.mxu0 %v1038_v0  ;;  %v1043_v5 = vld [vmem:[%s1419_s1 + $0xf0] sm:$0xff]   ;;  %v1047_v9 = vld [vmem:[%s1419_s1 + $0xe8] sm:$0xff]  }
   0x3   :  { %v1040_v2 = vld [vmem:[%s1419_s1 + $0x38] sm:$0xff]   ;;  %962 = vmatprep.subr.bf16.mxu1 %v1039_v1  ;;  %v1044_v6 = vld [vmem:[%s1419_s1 + $0x30] sm:$0xff]   ;;  %v1048_v10 = vld [vmem:[%s1419_s1 + $0x28] sm:$0xff]  }
   0x4   :  { %v1041_v3 = vld [vmem:[%s1419_s1 + $0xb8] sm:$0xff]   ;;  %941 = vmatpush3.bf16.msra.mxu0 %v1040_v2  ;;  %v1045_v7 = vld [vmem:[%s1419_s1 + $0xb0] sm:$0xff]   ;;  %v1049_v11 = vld [vmem:[%s1419_s1 + $0xa8] sm:$0xff]  }
   0x5   :  { %963 = vmatpush3.bf16.msra.mxu1 %v1041_v3  ;;  %942 = vmatprep.subr.bf16.mxu0 %v1042_v4  ;;  %v1050_v12 = vld [vmem:[%s1419_s1 + $0x60] sm:$0xff]   ;;  %v1054_v16 = vld [vmem:[%s1419_s1 + $0x58] sm:$0xff]   ;;  %v1058_v20 = vld [vmem:[%s1419_s1 + $0x50] sm:$0xff]  }
   0x6   :  { %964 = vmatprep.subr.bf16.mxu1 %v1043_v5  ;;  %v1051_v13 = vld [vmem:[%s1419_s1 + $0xe0] sm:$0xff]   ;;  %v1055_v17 = vld [vmem:[%s1419_s1 + $0xd8] sm:$0xff]   ;;  %v1059_v21 = vld [vmem:[%s1419_s1 + $0xd0] sm:$0xff]  }
   0x7   :  { %v1052_v14 = vld [vmem:[%s1419_s1 + $0x20] sm:$0xff]   ;;  %v1056_v18 = vld [vmem:[%s1419_s1 + $0x18] sm:$0xff]   ;;  %v1060_v22 = vld [vmem:[%s1419_s1 + $0x10] sm:$0xff]  }
   0x8   :  { %943 = vmatpush3.bf16.msra.mxu0 %v1044_v6  ;;  %v1053_v15 = vld [vmem:[%s1419_s1 + $0xa0] sm:$0xff]   ;;  %v1057_v19 = vld [vmem:[%s1419_s1 + $0x98] sm:$0xff]   ;;  %v1061_v23 = vld [vmem:[%s1419_s1 + $0x90] sm:$0xff]  }
   0x9   :  { %965 = vmatpush3.bf16.msra.mxu1 %v1045_v7  ;;  %944 = vmatprep.subr.bf16.mxu0 %v1046_v8  ;;  %v1062_v24 = vld [vmem:[%s1419_s1 + $0x48] sm:$0xff]   ;;  %v1066_v28 = vld [vmem:[%s1419_s1 + $0x40] sm:$0xff]   ;;  %v32_v33 = vld [vmem:[%s1420_s0 + $0x18] sm:$0xff] }
   0xa   :  { %966 = vmatprep.subr.bf16.mxu1 %v1047_v9  ;;  %v1063_v25 = vld [vmem:[%s1419_s1 + $0xc8] sm:$0xff]   ;;  %v1067_v29 = vld [vmem:[%s1419_s1 + $0xc0] sm:$0xff]   ;;  %v40_v36 = vpack.c.bf16 %v32_v33, %v32_v33  ;;  %v31_v38 = vld [vmem:[%s1420_s0 + $0x10] sm:$0xff] }
   0xb   :  { %v1064_v26 = vld [vmem:[%s1419_s1 + $0x8] sm:$0xff]   ;;  %v1068_v30 = vld [vmem:[%s1419_s1] sm:$0xff]   ;;  %v39_v39 = vpack.c.bf16 %v31_v38, %v31_v38  ;;  %v1070_v40 = vld [vmem:[%s1419_s1 + $0x178] sm:$0xff]  }
   0xc   :  { %945 = vmatpush3.bf16.msra.mxu0 %v1048_v10  ;;  %v1065_v27 = vld [vmem:[%s1419_s1 + $0x88] sm:$0xff]   ;;  %v1069_v31 = vld [vmem:[%s1419_s1 + $0x80] sm:$0xff]   ;;  %632 = vmatprep.mubr.bf16.mxu1 %v40_v36  ;;  %v1071_v42 = vld [vmem:[%s1419_s1 + $0x138] sm:$0xff]  }
   0xd   :  { %967 = vmatpush3.bf16.msra.mxu1 %v1049_v11  ;;  %946 = vmatprep.subr.bf16.mxu0 %v1050_v12  ;;  %v30_v32 = vld [vmem:[%s1420_s0 + $0x8] sm:$0xff]  ;;  %v29_v34 = vld [vmem:[%s1420_s0] sm:$0xff]  ;;  %v1072_v43 = vld [vmem:[%s1419_s1 + $0x1b8] sm:$0xff]  }
   0xe   :  { %968 = vmatprep.subr.bf16.mxu1 %v1051_v13  ;;  %v38_v35 = vpack.c.bf16 %v30_v32, %v30_v32  ;;  %v37_v37 = vpack.c.bf16 %v29_v34, %v29_v34  ;;  %v1073_v44 = vld [vmem:[%s1419_s1 + $0x170] sm:$0xff]   ;;  %v1076_v47 = vld [vmem:[%s1419_s1 + $0x168] sm:$0xff]   ;;  %v1079_v50 = vld [vmem:[%s1419_s1 + $0x160] sm:$0xff]  }
   0xf   :  { %v1074_v45 = vld [vmem:[%s1419_s1 + $0x130] sm:$0xff]   ;;  %v1077_v48 = vld [vmem:[%s1419_s1 + $0x128] sm:$0xff]   ;;  %v1080_v51 = vld [vmem:[%s1419_s1 + $0x120] sm:$0xff]  }
  0x10   :  { %947 = vmatpush3.bf16.msra.mxu0 %v1052_v14  ;;  %592 = vmatprep.mubr.bf16.mxu0 %v38_v35  ;;  %v1075_v46 = vld [vmem:[%s1419_s1 + $0x1b0] sm:$0xff]   ;;  %v1078_v49 = vld [vmem:[%s1419_s1 + $0x1a8] sm:$0xff]   ;;  %v1081_v52 = vld [vmem:[%s1419_s1 + $0x1a0] sm:$0xff]  }
  0x11   :  { %969 = vmatpush3.bf16.msra.mxu1 %v1053_v15  ;;  %948 = vmatprep.subr.bf16.mxu0 %v1054_v16  ;;  %v1082_v53 = vld [vmem:[%s1419_s1 + $0x158] sm:$0xff]   ;;  %v1085_v56 = vld [vmem:[%s1419_s1 + $0x150] sm:$0xff]   ;;  %v1088_v59 = vld [vmem:[%s1419_s1 + $0x148] sm:$0xff]  }
  0x12   :  { %970 = vmatprep.subr.bf16.mxu1 %v1055_v17  ;;  %v1083_v54 = vld [vmem:[%s1419_s1 + $0x118] sm:$0xff]   ;;  %v1086_v57 = vld [vmem:[%s1419_s1 + $0x110] sm:$0xff]   ;;  %v1089_v60 = vld [vmem:[%s1419_s1 + $0x108] sm:$0xff]  }
  0x13   :  { %v1084_v55 = vld [vmem:[%s1419_s1 + $0x198] sm:$0xff]   ;;  %v1087_v58 = vld [vmem:[%s1419_s1 + $0x190] sm:$0xff]   ;;  %v34_v61 = vld [vmem:[%s1420_s0 + $0x28] sm:$0xff] }
  0x14   :  { %949 = vmatpush3.bf16.msra.mxu0 %v1056_v18  ;;  %v1090_v62 = vld [vmem:[%s1419_s1 + $0x188] sm:$0xff]   ;;  %v42_v63 = vpack.c.bf16 %v34_v61, %v34_v61  ;;  %v1091_v0 = vld [vmem:[%s1419_s1 + $0x140] sm:$0xff]   ;;  %v1094_v4 = vld [vmem:[%s1419_s1 + $0x1f0] ss:$0 sps:$4 sm:$0xff]   ;;  %v1110_v18 = vmov 0.0  }
  0x15   :  { %971 = vmatpush3.bf16.msra.mxu1 %v1057_v19  ;;  %950 = vmatprep.subr.bf16.mxu0 %v1058_v20  ;;  %v1092_v1 = vld [vmem:[%s1419_s1 + $0x100] sm:$0xff]   ;;  %v36_v5 = vld [vmem:[%s1420_s0 + $0x38] sm:$0xff]  ;;  %v558_v8 = vsel %vm556_vm0, %v1094_v4, 0  ;;  %v1095_v9 = vld [vmem:[%s1419_s1 + $0x1e8] sm:$0xff]  }
  0x16   :  { %972 = vmatprep.subr.bf16.mxu1 %v1059_v21  ;;  %v1093_v2 = vld [vmem:[%s1419_s1 + $0x180] sm:$0xff]   ;;  %v44_v7 = vpack.c.bf16 %v36_v5, %v36_v5  ;;  %v1097_v11 = vld [vmem:[%s1419_s1 + $0x1d8] sm:$0xff]   ;;  %v1098_v12 = vld [vmem:[%s1419_s1 + $0x1d0] sm:$0xff]  }
  0x17   :  { %v33_v3 = vld [vmem:[%s1420_s0 + $0x20] sm:$0xff]  ;;  %v1099_v13 = vld [vmem:[%s1419_s1 + $0x1c8] sm:$0xff]   ;;  %v35_v15 = vld [vmem:[%s1420_s0 + $0x30] sm:$0xff] }
  0x18   :  { %951 = vmatpush3.bf16.msra.mxu0 %v1060_v22  ;;  %v41_v6 = vpack.c.bf16 %v33_v3, %v33_v3  ;;  %v1096_v10 = vld [vmem:[%s1419_s1 + $0x1e0] sm:$0xff]   ;;  %v43_v16 = vpack.c.bf16 %v35_v15, %v35_v15  ;;  %v1101_v17 = vld [vmem:[%s1421_s3 + $0x38] sm:$0xff]   ;;  %v1102_v19 = vld [vmem:[%s1421_s3 + $0x30] sm:$0xff]  }
  0x19   :  { %973 = vmatpush3.bf16.msra.mxu1 %v1061_v23  ;;  %952 = vmatprep.subr.bf16.mxu0 %v1062_v24  ;;  %v1100_v14 = vld [vmem:[%s1419_s1 + $0x1c0] sm:$0xff]   ;;  %v1103_v20 = vld [vmem:[%s1421_s3 + $0x28] sm:$0xff]   ;;  %v1105_v22 = vld [vmem:[%s1421_s3 + $0x18] sm:$0xff]  }
  0x1a   :  { %974 = vmatprep.subr.bf16.mxu1 %v1063_v25  ;;  %v1104_v21 = vld [vmem:[%s1421_s3 + $0x20] sm:$0xff]   ;;  %v1106_v23 = vld [vmem:[%s1421_s3 + $0x10] sm:$0xff]   ;;  %v1107_v24 = vld [vmem:[%s1421_s3 + $0x8] sm:$0xff]  }
  0x1b   :  { %v1108_v25 = vld [vmem:[%s1421_s3] sm:$0xff]  }
  0x1c   :  { %953 = vmatpush3.bf16.msra.mxu0 %v1064_v26 }
  0x1d   :  { %975 = vmatpush3.bf16.msra.mxu1 %v1065_v27  ;;  %954 = vmatprep.subr.bf16.mxu0 %v1066_v28 }
  0x1e   :  { %976 = vmatprep.subr.bf16.mxu1 %v1067_v29 }
  0x20   :  { %955 = vmatpush3.bf16.msra.mxu0 %v1068_v30 }
  0x21   :  { %977 = vmatpush3.bf16.msra.mxu1 %v1069_v31  ;;  %984 = vmatprep.subr.bf16.mxu0 %v1070_v40 }
  0x22   :  { %680 = vmatprep.subr.bf16.mxu1 %v1109_v41 }
  0x23   :  { %593 = vmatmul.mubr.bf16.vlgmr.msra.gmra.mxu0 %v37_v37 }
  0x24   :  { %633 = vmatmul.mubr.bf16.vlgmr.msra.gmra.mxu1 %v39_v39  ;;  %985 = vmatpush3.bf16.msra.mxu0 %v1071_v42  ;;  %v864_v39 = vld [vmem:[%s1422_s2] ss:$0 sm:$0xff] }
  0x25   :  { %681 = vmatpush1.bf16.msra.mxu1 %v1072_v43  ;;  %986 = vmatprep.subr.bf16.mxu0 %v1073_v44 }
  0x26   :  { %682 = vmatprep.subr.bf16.mxu1 %v1109_v41  ;;  %672 = vmatprep.mubr.bf16.mxu0 %v42_v63 }
  0x27   :  { %928 = vmatprep.mubr.msk.bf16.mxu1 %vm552_vm1, %v44_v7 }
  0x28   :  { %987 = vmatpush3.bf16.msra.mxu0 %v1074_v45 }
  0x29   :  { %683 = vmatpush1.bf16.msra.mxu1 %v1075_v46  ;;  %988 = vmatprep.subr.bf16.mxu0 %v1076_v47 }
  0x2a   :  { %684 = vmatprep.subr.bf16.mxu1 %v1109_v41 }
  0x2c   :  { %989 = vmatpush3.bf16.msra.mxu0 %v1077_v48 }
  0x2d   :  { %685 = vmatpush1.bf16.msra.mxu1 %v1078_v49  ;;  %990 = vmatprep.subr.bf16.mxu0 %v1079_v50 }
  0x2e   :  { %686 = vmatprep.subr.bf16.mxu1 %v1109_v41 }
  0x30   :  { %991 = vmatpush3.bf16.msra.mxu0 %v1080_v51 }
  0x31   :  { %687 = vmatpush1.bf16.msra.mxu1 %v1081_v52  ;;  %992 = vmatprep.subr.bf16.mxu0 %v1082_v53  ;;  %v12_v53 = vstv %s1423_s6 }
  0x32   :  { %688 = vmatprep.subr.bf16.mxu1 %v1109_v41  ;;  %13 = vst [vmem:[#allocation2] sm:$0x1] %v12_v53 }
  0x34   :  { %993 = vmatpush3.bf16.msra.mxu0 %v1083_v54  ;;  %v929_v54 = vld [vmem:[%s1424_s4] ss:$0 sm:$0xff] }
  0x35   :  { %689 = vmatpush1.bf16.msra.mxu1 %v1084_v55  ;;  %994 = vmatprep.subr.bf16.mxu0 %v1085_v56 }
  0x36   :  { %690 = vmatprep.subr.bf16.mxu1 %v1109_v41 }
  0x38   :  { %995 = vmatpush3.bf16.msra.mxu0 %v1086_v57 }
  0x39   :  { %691 = vmatpush1.bf16.msra.mxu1 %v1087_v58  ;;  %996 = vmatprep.subr.bf16.mxu0 %v1088_v59  ;;  %v938_v59 = vld [vmem:[%s1425_s5] ss:$0 sm:$0xff] }
  0x3a   :  { %692 = vmatprep.subr.bf16.mxu1 %v1109_v41 }
  0x3c   :  { %997 = vmatpush3.bf16.msra.mxu0 %v1089_v60 }
  0x3d   :  { %693 = vmatpush1.bf16.msra.mxu1 %v1090_v62  ;;  %998 = vmatprep.subr.bf16.mxu0 %v1091_v0 }
  0x3e   :  { %694 = vmatprep.subr.bf16.mxu1 %v1109_v41 }
  0x40   :  { %999 = vmatpush3.bf16.msra.mxu0 %v1092_v1  ;;  %v939_v1 = vld [vmem:[#allocation2] ss:$0 sm:$0xff] }
  0x41   :  { %695 = vmatpush1.bf16.msra.mxu1 %v1093_v2  ;;  %1015 = vmatprep.subr.bf16.mxu0 %v1110_v18 }
  0x42   :  { %698 = vmatprep.subr.bf16.mxu1 %v1109_v41 }
  0x43   :  { %673 = vmatmul.mubr.bf16.vlgmr.msra.gmra.mxu0 %v41_v6 }
  0x44   :  { %1016 = vmatpush3.bf16.msra.mxu0 %v1101_v17  ;;  %1031 = vmatprep.mubr.msk.bf16.mxu0 %vm1111_vm2, %v1110_v18 }
  0x45   :  { %699 = vmatpush2.bf16.msra.mxu1 %v558_v8  ;;  %1017 = vmatprep.subr.bf16.mxu0 %v1110_v18 }
  0x46   :  { %700 = vmatprep.subr.bf16.mxu1 %v1109_v41 }
  0x48   :  { %1018 = vmatpush3.bf16.msra.mxu0 %v1102_v19 }
  0x49   :  { %701 = vmatpush2.bf16.msra.mxu1 %v1095_v9  ;;  %1019 = vmatprep.subr.bf16.mxu0 %v1110_v18 }
  0x4a   :  { %702 = vmatprep.subr.bf16.mxu1 %v1109_v41 }
  0x4c   :  { %1020 = vmatpush3.bf16.msra.mxu0 %v1103_v20 }
  0x4d   :  { %703 = vmatpush2.bf16.msra.mxu1 %v1096_v10  ;;  %1021 = vmatprep.subr.bf16.mxu0 %v1110_v18 }
  0x4e   :  { %704 = vmatprep.subr.bf16.mxu1 %v1109_v41 }
  0x50   :  { %1022 = vmatpush3.bf16.msra.mxu0 %v1104_v21 }
  0x51   :  { %705 = vmatpush2.bf16.msra.mxu1 %v1097_v11  ;;  %1023 = vmatprep.subr.bf16.mxu0 %v1110_v18 }
  0x52   :  { %706 = vmatprep.subr.bf16.mxu1 %v1109_v41 }
  0x54   :  { %1024 = vmatpush3.bf16.msra.mxu0 %v1105_v22 }
  0x55   :  { %707 = vmatpush2.bf16.msra.mxu1 %v1098_v12  ;;  %1025 = vmatprep.subr.bf16.mxu0 %v1110_v18 }
  0x56   :  { %708 = vmatprep.subr.bf16.mxu1 %v1109_v41 }
  0x58   :  { %1026 = vmatpush3.bf16.msra.mxu0 %v1106_v23 }
  0x59   :  { %709 = vmatpush2.bf16.msra.mxu1 %v1099_v13  ;;  %1027 = vmatprep.subr.bf16.mxu0 %v1110_v18 }
  0x5a   :  { %710 = vmatprep.subr.bf16.mxu1 %v1109_v41 }
  0x5c   :  { %1028 = vmatpush3.bf16.msra.mxu0 %v1107_v24 }
  0x5d   :  { %711 = vmatpush2.bf16.msra.mxu1 %v1100_v14  ;;  %1029 = vmatprep.subr.bf16.mxu0 %v1110_v18 }
  0x60   :  { %713 = vmatmul.mubr.bf16.vlgmr.msra.gmra.mxu1 %v43_v16  ;;  %1030 = vmatpush3.bf16.msra.mxu0 %v1108_v25 }
  0xe3   :  { %v956_v26 = vpop.f32.mrf.mxu0 }
  0xe4   :  { %v978_v27 = vpop.f32.mrf.mxu1 }
  0xe5   :  { %v957_v28 = vpop.f32.mrf.mxu0 }
  0xe6   :  { %v979_v29 = vpop.f32.mrf.mxu1  ;;  %v958_v38 = vadd.f32 %v957_v28, %v956_v26 }
  0xe7   :  { %v959_v31 = vpop.f32.mrf.mxu0  ;;  %v980_v41 = vadd.f32 %v979_v29, %v978_v27 }
  0xe8   :  { %v981_v30 = vpop.f32.mrf.mxu1  ;;  %v595_v40 = vadd.f32 %v958_v38, %v864_v39 }
  0xe9   :  { %v960_v33 = vpop.f32.mrf.mxu0 }
  0xea   :  { %v982_v32 = vpop.f32.mrf.mxu1  ;;  %v635_v43 = vadd.f32 %v980_v41, %v595_v40 }
 0x103   :  { %v1000_v34 = vpop.f32.mrf.mxu0 }
 0x105   :  { %v1001_v35 = vpop.f32.mrf.mxu0 }
 0x106   :  { %v1002_v42 = vadd.f32 %v1001_v35, %v1000_v34 }
 0x107   :  { %v1003_v36 = vpop.f32.mrf.mxu0 }
 0x108   :  { %v675_v44 = vadd.f32 %v1002_v42, %v635_v43 }
 0x109   :  { %v1004_v37 = vpop.f32.mrf.mxu0 }
 0x120   :  { %v714_v45 = vpop.f32.mrf.mxu1 }
 0x121   :  { %v715_v46 = vadd.f32 %v714_v45, %v675_v44 }
 0x122   :  { %v716_v47 = vpop.f32.mrf.mxu1 }
 0x123   :  { %vm720_vm3 = vcmp.gt.f32.partialorder %v715_v46, 0.0  ;;  %v721_v48 = vmul.f32 0.2, %v715_v46 }
 0x124   :  { %v717_v49 = vpop.f32.mrf.mxu1 }
 0x125   :  { %v722_v50 = vsel %vm720_vm3, %v715_v46, %v721_v48 }
 0x126   :  { %v723_v51 = vpack.c.bf16 %v722_v50, %v722_v50  ;;  %v718_v52 = vpop.f32.mrf.mxu1 }
 0x128   :  { %1032 = vmatmul.mubr.bf16.vlgmr.msra.gmra.mxu0 %v723_v51 }
 0x1e8   :  { %v829_v55 = vpop.f32.mrf.mxu0 }
 0x1e9   :  { %v830_v56 = vadd.f32 %v929_v54, %v829_v55 }
 0x1ea   :  { %v1033_v57 = vpop.f32.mrf.mxu0 }
 0x1eb   :  { %v836_v58 = vmul.f32 0.2, %v830_v56  ;;  %vm835_vm4 = vcmp.gt.f32.partialorder %v830_v56, 0.0 }
 0x1ec   :  { %v832_v60 = vpop.f32.mrf.mxu0 }
 0x1ed   :  { %v837_v61 = vsel %vm835_vm4, %v830_v56, %v836_v58 }
 0x1ee   :  { %v1034_v62 = vpop.f32.mrf.mxu0  ;;  %v845_v63 = vmul.f32 %v938_v59, %v837_v61 }
 0x1f0   :  { %v847_v0 = vsel %vm846_vm5, %v845_v63, 0.0 }
 0x1f1   :  { %848 = vadd.xlane.f32.xlu0 %v847_v0 }
 0x27a   :  { %v849_v2 = vpop.xlane.xlu0 %848 }
 0x27b   :  { %v857_v3 = vadd.f32 %v939_v1, %v849_v2 }
 0x27d   :  { %859 = vst.msk [vmem:[%s1426_s7] sm:$0xff] %vm858_vm6, %v857_v3 }

</bundles_post_ra>
